<compile_context>
chip_gen: v5e
topology: v5e:2x2
jax: 0.10.0
libtpu: 0.0.40
codegen_flags: <defaults>
</compile_context>

<pallas_src>
import math

import jax
import jax.numpy as jnp
from jax import lax
from jax.experimental import pallas as pl
from jax.experimental.pallas import tpu as pltpu


def _attn_kernel(q_ref, k_ref, v_ref, wq_ref, bq_ref, wk_ref, bk_ref, o_ref):
    # q_ref:  (B, Nq, D)  f32
    # k_ref:  (B, Nk, D)  f32
    # v_ref:  (B, Nk, Dv) f32
    # wq_ref: (D, D) bf16  (raw PyTorch orientation: (out, in))
    # bq_ref: (1, D) f32
    # wk_ref: (D, D) bf16
    # bk_ref: (1, D) f32
    B, Nq, D = q_ref.shape
    _, Nk, Dv = v_ref.shape
    scale = 1.0 / math.sqrt(k_ref.shape[-1])   # dim_k = key feature dim (static)

    # Batch the projections: one MXU matmul for all B*Nq (resp. B*Nk) rows.
    # nn.Linear is y = x @ W^T + b; contract the last dims of x and W directly
    # (no transpose materialized).  Cast to bf16 once, accumulate in f32.
    q_in = q_ref[...].reshape(B * Nq, D).astype(jnp.bfloat16)
    k_in = k_ref[...].reshape(B * Nk, D).astype(jnp.bfloat16)

    q = lax.dot_general(q_in, wq_ref[...],
                        dimension_numbers=(((1,), (1,)), ((), ())),
                        preferred_element_type=jnp.float32) + bq_ref[...]
    k = lax.dot_general(k_in, wk_ref[...],
                        dimension_numbers=(((1,), (1,)), ((), ())),
                        preferred_element_type=jnp.float32) + bk_ref[...]

    q_b = q.astype(jnp.bfloat16).reshape(B, Nq, D)
    k_b = k.astype(jnp.bfloat16).reshape(B, Nk, D)

    # dot_score = q @ k^T / sqrt(dim_k): batched contraction of the feature dim,
    # scale applied once as a scalar mul on the f32 scores.
    s = jnp.einsum("bqd,bkd->bqk", q_b, k_b,
                   preferred_element_type=jnp.float32) * scale   # (B, Nq, Nk)

    # numerically stable softmax over the key axis, all in f32
    m = jnp.max(s, axis=-1, keepdims=True)
    p = jnp.exp(s - m)
    denom = jnp.sum(p, axis=-1, keepdims=True)
    attn = p * pl.reciprocal(denom, approx=True)                 # (B, Nq, Nk)

    # output = attention_weight @ value (f32 accumulation)
    v_b = v_ref[...].astype(jnp.bfloat16)
    out = jnp.einsum("bqk,bkd->bqd", attn.astype(jnp.bfloat16), v_b,
                     preferred_element_type=jnp.float32)         # (B, Nq, Dv)
    o_ref[...] = out.astype(o_ref.dtype)


def init_attention_params(wq, bq, wk, bk):
    """One-time, model-load-time prep (NOT in the per-call path)."""
    return (wq.astype(jnp.bfloat16),
            bq.reshape(1, -1).astype(jnp.float32),
            wk.astype(jnp.bfloat16),
            bk.reshape(1, -1).astype(jnp.float32))


def attention_forward(query, key, value, params):
    """query: (B, Nq, D), key: (B, Nk, D), value: (B, Nk, Dv). All f32.
    Single pallas_call, no grid (whole problem in one VMEM-resident step)."""
    B, Nq, D = query.shape
    _, Nk, Dk = key.shape
    _, _, Dv = value.shape
    assert D == Dk, "q/k feature dims must match for q @ k^T"
    wq_b, bq2, wk_b, bk2 = params

    vmem = pl.BlockSpec(memory_space=pltpu.MemorySpace.VMEM)
    return pl.pallas_call(
        _attn_kernel,
        out_shape=jax.ShapeDtypeStruct((B, Nq, Dv), query.dtype),
        in_specs=[vmem] * 7,
        out_specs=vmem,
    )(query, key, value, wq_b, bq2, wk_b, bk2)


def reference_forward(query, key, value, wq, bq, wk, bk):
    q = jnp.einsum("bnd,od->bno", query, wq) + bq
    k = jnp.einsum("bnd,od->bno", key, wk) + bk
    s = jnp.einsum("bqd,bkd->bqk", q, k) / math.sqrt(key.shape[-1])
    w = jax.nn.softmax(s, axis=-1)
    return jnp.einsum("bqk,bkd->bqd", w, value)


if __name__ == "__main__":
    B, Nq, Nk, D, Dv = 2, 8, 16, 32, 32
    key_rng = jax.random.PRNGKey(0)
    k0, k1, k2, k3, k4, k5, k6 = jax.random.split(key_rng, 7)

    query = jax.random.normal(k0, (B, Nq, D), dtype=jnp.float32)
    key_t = jax.random.normal(k1, (B, Nk, D), dtype=jnp.float32)
    value = jax.random.normal(k2, (B, Nk, Dv), dtype=jnp.float32)

    # Deterministic "Linear" parameters (uniform like PyTorch's default init).
    bound = 1.0 / math.sqrt(D)
    wq = jax.random.uniform(k3, (D, D), minval=-bound, maxval=bound, dtype=jnp.float32)
    bq = jax.random.uniform(k4, (D,), minval=-bound, maxval=bound, dtype=jnp.float32)
    wk = jax.random.uniform(k5, (D, D), minval=-bound, maxval=bound, dtype=jnp.float32)
    bk = jax.random.uniform(k6, (D,), minval=-bound, maxval=bound, dtype=jnp.float32)

    # Model-load-time prep (done once, outside the per-call path).
    params = init_attention_params(wq, bq, wk, bk)

    out = attention_forward(query, key_t, value, params)
    jax.block_until_ready(out)

    ref = reference_forward(query, key_t, value, wq, bq, wk, bk)
    assert out.shape == (B, Nq, Dv)
    # bf16 MXU operands (f32 accumulation + f32 softmax, approx reciprocal) =>
    # bf16-appropriate tolerance.
    assert jnp.allclose(out, ref, atol=5e-2, rtol=5e-2), \
        f"max abs err {jnp.max(jnp.abs(out - ref))}"

    print("KERNEL_OK")
</pallas_src>

<mosaic_0001>
module attributes {stable_mosaic.version = 11 : i64} {
  func.func @_attn_kernel(%arg0: memref<2x8x32xf32, #tpu.memory_space<vmem>>, %arg1: memref<2x16x32xf32, #tpu.memory_space<vmem>>, %arg2: memref<2x16x32xf32, #tpu.memory_space<vmem>>, %arg3: memref<32x32xbf16, #tpu.memory_space<vmem>>, %arg4: memref<1x32xf32, #tpu.memory_space<vmem>>, %arg5: memref<32x32xbf16, #tpu.memory_space<vmem>>, %arg6: memref<1x32xf32, #tpu.memory_space<vmem>>, %arg7: memref<2x8x32xf32, #tpu.memory_space<vmem>>) attributes {dimension_semantics = [], scalar_prefetch = 0 : i64, scratch_operands = 0 : i64, tpu.core_type = #tpu.core_type<tc>} {
    %c0 = arith.constant 0 : index
    %c0_0 = arith.constant 0 : index
    %c0_1 = arith.constant 0 : index
    %0 = vector.load %arg0[%c0, %c0_0, %c0_1] : memref<2x8x32xf32, #tpu.memory_space<vmem>>, vector<2x8x32xf32>
    %1 = vector.shape_cast %0 : vector<2x8x32xf32> to vector<16x32xf32>
    %2 = arith.truncf %1 : vector<16x32xf32> to vector<16x32xbf16>
    %c0_2 = arith.constant 0 : index
    %c0_3 = arith.constant 0 : index
    %c0_4 = arith.constant 0 : index
    %3 = vector.load %arg1[%c0_2, %c0_3, %c0_4] : memref<2x16x32xf32, #tpu.memory_space<vmem>>, vector<2x16x32xf32>
    %4 = vector.shape_cast %3 : vector<2x16x32xf32> to vector<32x32xf32>
    %5 = arith.truncf %4 : vector<32x32xf32> to vector<32x32xbf16>
    %c0_5 = arith.constant 0 : index
    %c0_6 = arith.constant 0 : index
    %6 = vector.load %arg3[%c0_5, %c0_6] : memref<32x32xbf16, #tpu.memory_space<vmem>>, vector<32x32xbf16>
    %cst = arith.constant dense<0.000000e+00> : vector<16x32xf32>
    %7 = tpu.matmul %2, %6, %cst {dimension_numbers = #tpu.dot_dimension_numbers<[1], [1], [0], [0], [0, 0, 1, 0], [], []>} : vector<16x32xbf16>, vector<32x32xbf16>, vector<16x32xf32> -> vector<16x32xf32>
    %c0_7 = arith.constant 0 : index
    %c0_8 = arith.constant 0 : index
    %8 = vector.load %arg4[%c0_7, %c0_8] : memref<1x32xf32, #tpu.memory_space<vmem>>, vector<1x32xf32>
    %9 = vector.broadcast %8 : vector<1x32xf32> to vector<16x32xf32>
    %10 = arith.addf %7, %9 : vector<16x32xf32>
    %c0_9 = arith.constant 0 : index
    %c0_10 = arith.constant 0 : index
    %11 = vector.load %arg5[%c0_9, %c0_10] : memref<32x32xbf16, #tpu.memory_space<vmem>>, vector<32x32xbf16>
    %cst_11 = arith.constant dense<0.000000e+00> : vector<32x32xf32>
    %12 = tpu.matmul %5, %11, %cst_11 {dimension_numbers = #tpu.dot_dimension_numbers<[1], [1], [0], [0], [0, 0, 1, 0], [], []>} : vector<32x32xbf16>, vector<32x32xbf16>, vector<32x32xf32> -> vector<32x32xf32>
    %c0_12 = arith.constant 0 : index
    %c0_13 = arith.constant 0 : index
    %13 = vector.load %arg6[%c0_12, %c0_13] : memref<1x32xf32, #tpu.memory_space<vmem>>, vector<1x32xf32>
    %14 = vector.broadcast %13 : vector<1x32xf32> to vector<32x32xf32>
    %15 = arith.addf %12, %14 : vector<32x32xf32>
    %16 = arith.truncf %10 : vector<16x32xf32> to vector<16x32xbf16>
    %17 = vector.shape_cast %16 : vector<16x32xbf16> to vector<2x8x32xbf16>
    %18 = arith.truncf %15 : vector<32x32xf32> to vector<32x32xbf16>
    %19 = vector.shape_cast %18 : vector<32x32xbf16> to vector<2x16x32xbf16>
    "tpu.trace_start"() <{level = 10 : i32, message = "bqd,bkd->bqk"}> : () -> ()
    %cst_14 = arith.constant dense<0.000000e+00> : vector<2x8x16xf32>
    %20 = tpu.matmul %17, %19, %cst_14 {dimension_numbers = #tpu.dot_dimension_numbers<[2], [2], [1], [1], [0, 0, 0, 1, 1, 1], [0], [0]>} : vector<2x8x32xbf16>, vector<2x16x32xbf16>, vector<2x8x16xf32> -> vector<2x8x16xf32>
    "tpu.trace_stop"() : () -> ()
    %cst_15 = arith.constant 0.176776692 : f32
    %21 = vector.broadcast %cst_15 : f32 to vector<2x8x16xf32>
    %22 = arith.mulf %20, %21 : vector<2x8x16xf32>
    %cst_16 = arith.constant dense<0xFF800000> : vector<2x8xf32>
    %23 = vector.multi_reduction <maximumf>, %22, %cst_16 [2] : vector<2x8x16xf32> to vector<2x8xf32>
    %24 = vector.shape_cast %23 : vector<2x8xf32> to vector<2x8x1xf32>
    %25 = vector.broadcast %24 : vector<2x8x1xf32> to vector<2x8x16xf32>
    %26 = arith.subf %22, %25 : vector<2x8x16xf32>
    %27 = math.exp %26 : vector<2x8x16xf32>
    %cst_17 = arith.constant dense<0.000000e+00> : vector<2x8xf32>
    %28 = vector.multi_reduction <add>, %27, %cst_17 [2] : vector<2x8x16xf32> to vector<2x8xf32>
    %29 = vector.shape_cast %28 : vector<2x8xf32> to vector<2x8x1xf32>
    %30 = tpu.reciprocal %29 {approx = true} : vector<2x8x1xf32> -> vector<2x8x1xf32>
    %31 = vector.broadcast %30 : vector<2x8x1xf32> to vector<2x8x16xf32>
    %32 = arith.mulf %27, %31 : vector<2x8x16xf32>
    %c0_18 = arith.constant 0 : index
    %c0_19 = arith.constant 0 : index
    %c0_20 = arith.constant 0 : index
    %33 = vector.load %arg2[%c0_18, %c0_19, %c0_20] : memref<2x16x32xf32, #tpu.memory_space<vmem>>, vector<2x16x32xf32>
    %34 = arith.truncf %33 : vector<2x16x32xf32> to vector<2x16x32xbf16>
    %35 = arith.truncf %32 : vector<2x8x16xf32> to vector<2x8x16xbf16>
    "tpu.trace_start"() <{level = 10 : i32, message = "bqk,bkd->bqd"}> : () -> ()
    %cst_21 = arith.constant dense<0.000000e+00> : vector<2x8x32xf32>
    %36 = tpu.matmul %35, %34, %cst_21 {dimension_numbers = #tpu.dot_dimension_numbers<[2], [1], [1], [2], [0, 0, 0, 1, 1, 2], [0], [0]>} : vector<2x8x16xbf16>, vector<2x16x32xbf16>, vector<2x8x32xf32> -> vector<2x8x32xf32>
    "tpu.trace_stop"() : () -> ()
    %c0_22 = arith.constant 0 : index
    %c0_23 = arith.constant 0 : index
    %c0_24 = arith.constant 0 : index
    %37 = vector.load %arg7[%c0_22, %c0_23, %c0_24] : memref<2x8x32xf32, #tpu.memory_space<vmem>>, vector<2x8x32xf32>
    tpu.vector_store %arg7[%c0_22, %c0_23, %c0_24], %36 {strides = array<i32>} : memref<2x8x32xf32, #tpu.memory_space<vmem>>, vector<2x8x32xf32>,
    return
  }
}

</mosaic_0001>

<bundles_post_ra>
// kernel: tpu_custom_call.1
= control target key start
LH: loop header
LB: loop body
LE: loop exit
PB: predicated region body
PF: predicated region fallthrough
CT: control target
= control target key end

     0   :  { %12 = vsyncpa [#allocation3], 0  ;;  %s666_s0 = inlined_call_operand.hbm [shape: f32[2,8,32], index: 0, kind: input, shape index: {}]   ;;  %s667_s1 = inlined_call_operand.hbm [shape: f32[2,16,32], index: 1, kind: input, shape index: {}]   ;;  %s668_s2 = inlined_call_operand.hbm [shape: f32[2,16,32], index: 2, kind: input, shape index: {}]   ;;  %s669_s3 = inlined_call_operand.hbm [shape: bf16[32,32], index: 3, kind: input, shape index: {}]   ;;  %s670_s4 = inlined_call_operand.vmem [shape: f32[1,32], index: 4, kind: input, shape index: {}]   ;;  %s671_s5 = inlined_call_operand.hbm [shape: bf16[32,32], index: 5, kind: input, shape index: {}]   ;;  %s672_s6 = inlined_call_operand.vmem [shape: f32[1,32], index: 6, kind: input, shape index: {}]   ;;  %s673_s7 = inlined_call_operand.hbm [shape: f32[2,8,32], index: 7, kind: output, shape index: {}]  }
   0x1   :  { %13 = vsyncpa [#allocation6], 0 }
   0x2   :  { %14 = vsyncpa [#allocation9], 0 }
   0x3   :  { %15 = vsyncpa [#allocation4], 0  ;;  %s33_s26 = sshll.u32 %s667_s1, 4  ;;  %s561_s27 = smov [#allocation5]   ;;  %s34_s26 = int_to_ptr.hbm [resolvable:$true] %s33_s26 }
   0x4   :  { %s35_s28 = sshll.u32 %s561_s27, 4  ;;  %s59_s8 = sshll.u32 %s669_s3, 4  ;;  %s36_s28 = int_to_ptr.vmem [resolvable:$true] %s35_s28  ;;  %s60_s8 = int_to_ptr.hbm [resolvable:$true] %s59_s8 }
   0x5   :  { %s562_s9 = smov 128   ;;  %s563_s10 = smov 8  }
   0x6   :  { %41 = dma.hbm_to_vmem [thread:$0]  %s34_s26, 512, %s36_s28, [#allocation6], %s562_s9, %s562_s9, %s563_s10  }
   0x7   :  { %s564_s11 = smov [#allocation8]   ;;  %s565_s13 = smov 64  }
   0x8   :  { %s61_s12 = sshll.u32 %s564_s11, 4  ;;  %s566_s1 = smov 4   ;;  %s62_s12 = int_to_ptr.vmem [resolvable:$true] %s61_s12 }
   0x9   :  { %67 = dma.hbm_to_vmem [thread:$0]  %s60_s8, 256, %s62_s12, [#allocation9], %s565_s13, %s565_s13, %s566_s1  }
   0xa   :  { %s20_s16 = sshll.u32 %s666_s0, 4  ;;  %s567_s17 = smov [#allocation2]   ;;  %s21_s16 = int_to_ptr.hbm [resolvable:$true] %s20_s16 }
   0xb   :  { %s22_s3 = sshll.u32 %s567_s17, 4  ;;  %s46_s20 = sshll.u32 %s668_s2, 4  ;;  %s23_s3 = int_to_ptr.vmem [resolvable:$true] %s22_s3  ;;  %s47_s20 = int_to_ptr.hbm [resolvable:$true] %s46_s20 }
   0xc   :  { %28 = dma.hbm_to_vmem [thread:$0]  %s21_s16, 256, %s23_s3, [#allocation3], %s562_s9, %s562_s9, %s563_s10  }
   0xd   :  { %s568_s21 = smov [#allocation7]   ;;  %s74_s25 = sshll.u32 %s671_s5, 4  ;;  %s75_s25 = int_to_ptr.hbm [resolvable:$true] %s74_s25 }
   0xe   :  { %s48_s22 = sshll.u32 %s568_s21, 4  ;;  %s569_s0 = smov [#allocation10]   ;;  %s49_s22 = int_to_ptr.vmem [resolvable:$true] %s48_s22 }
   0xf   :  { %54 = dma.hbm_to_vmem [thread:$0]  %s47_s20, 512, %s49_s22, [#allocation6], %s562_s9, %s562_s9, %s563_s10  }
  0x10   :  { %s76_s26 = sshll.u32 %s569_s0, 4  ;;  %s77_s26 = int_to_ptr.vmem [resolvable:$true] %s76_s26 }
  0x11   :  { %82 = dma.hbm_to_vmem [thread:$0]  %s75_s25, 256, %s77_s26, [#allocation9], %s565_s13, %s565_s13, %s566_s1  }
  0x12   :  { %553 = dma.done.wait [#allocation3], 256  }
  0x13   :  { %554 = vsyncadd [#allocation3], 4294967040 }
  0x14   :  { %555 = dma.done.wait [#allocation6], 1024  }
  0x15   :  { %556 = vsyncadd [#allocation6], 4294966272 }
  0x16   :  { %557 = dma.done.wait [#allocation9], 512  }
  0x17   :  { %558 = vsyncadd [#allocation9], 4294966784  ;;  %vm133_vm0 = vcmask 261120   ;;  %v388_v0 = vld [vmem:[#allocation10 + $0x8] sm:$0xff]  ;;  %v386_v1 = vld [vmem:[#allocation8 + $0x8] sm:$0xff]  ;;  %vm262_vm1 = vcmask 130048  }
  0x18   :  { %v185_v2 = vsel %vm133_vm0, %v388_v0, 0  ;;  %v141_v3 = vsel %vm133_vm0, %v386_v1, 0  ;;  %v387_v4 = vld [vmem:[#allocation10] sm:$0xff]  ;;  %v385_v5 = vld [vmem:[#allocation8] sm:$0xff]  ;;  %v110_v9 = vld [vmem:[#allocation5 + $0x8] sm:$0xff]  ;;  %s347_s8 = sshll.u32 %s673_s7, 4  ;;  %s348_s8 = int_to_ptr.hbm [resolvable:$true] %s347_s8 }
  0x19   :  { %193 = vmatpush.bf16.xpose.msra.mxu1 %v185_v2  ;;  %149 = vmatpush.bf16.xpose.msra.mxu0 %v141_v3  ;;  %v182_v6 = vsel %vm133_vm0, %v387_v4, 0  ;;  %v138_v7 = vsel %vm133_vm0, %v385_v5, 0  ;;  %v109_v8 = vld [vmem:[#allocation5] sm:$0xff]  ;;  %v106_v10 = vld [vmem:[#allocation2] sm:$0xff]  ;;  %v107_v11 = vld [vmem:[#allocation2 + $0x8] sm:$0xff] }
  0x1a   :  { %v113_v12 = vpack.c.bf16 %v110_v9, %v109_v8  ;;  %v108_v13 = vpack.c.bf16 %v107_v11, %v106_v10  ;;  %v111_v14 = vld [vmem:[#allocation5 + $0x10] sm:$0xff]  ;;  %v112_v15 = vld [vmem:[#allocation5 + $0x18] sm:$0xff]  ;;  %v285_v63 = vld [vmem:[#allocation7] sm:$0xff] }
  0x1b   :  { %v114_v16 = vpack.c.bf16 %v112_v15, %v111_v14  ;;  %v399_v18 = vld [vmem:[%s672_s6] ss:$0 sm:$0xff]  ;;  %v286_v0 = vld [vmem:[#allocation7 + $0x8] sm:$0xff]  ;;  %v289_v1 = vpack.c.bf16 %v285_v63, %v285_v63 }
  0x1c   :  { %v400_v26 = vld [vmem:[%s670_s4] ss:$0 sm:$0xff]  ;;  %v290_v2 = vpack.c.bf16 %v286_v0, %v286_v0  ;;  %s570_s4 = smov [#allocation11]  }
  0x1d   :  { %v297_v3 = vunpack.c.l.b16 %v289_v1  ;;  %s345_s6 = sshll.u32 %s570_s4, 4  ;;  %s346_s6 = int_to_ptr.vmem [resolvable:$true] %s345_s6 }
  0x1e   :  { %v298_v4 = vunpack.c.l.b16 %v290_v2 }
  0x20   :  { %v299_v5 = vpack.c.b16 %v298_v4, %v297_v3 }
  0x21   :  { %194 = vmatpush.bf16.xpose.msra.mxu1 %v182_v6  ;;  %150 = vmatpush.bf16.xpose.msra.mxu0 %v138_v7  ;;  %v287_v6 = vld [vmem:[#allocation7 + $0x10] sm:$0xff]  ;;  %v288_v7 = vld [vmem:[#allocation7 + $0x18] sm:$0xff] }
  0x22   :  { %v291_v8 = vpack.c.bf16 %v287_v6, %v287_v6  ;;  %v292_v9 = vpack.c.bf16 %v288_v7, %v288_v7 }
  0x24   :  { %v319_v10 = vunpack.c.l.b16 %v291_v8  ;;  %v320_v11 = vunpack.c.l.b16 %v292_v9 }
  0x28   :  { %379 = vmatmul.msk.bf16.vlgmr.msra.gmra.mxu1 %vm133_vm0, %v113_v12  ;;  %370 = vmatmul.msk.bf16.vlgmr.msra.gmra.mxu0 %vm133_vm0, %v108_v13  ;;  %v321_v12 = vpack.c.b16 %v320_v11, %v319_v10 }
  0x38   :  { %380 = vmatmul.msk.bf16.gmra.mxu1 %vm133_vm0, %v114_v16 }
  0xa5   :  { %v196_v17 = vpop.f32.mrf.mxu1  ;;  %v152_v27 = vpop.f32.mrf.mxu0 }
  0xa6   :  { %v197_v19 = vadd.f32 %v399_v18, %v196_v17  ;;  %v153_v31 = vadd.f32 %v400_v26, %v152_v27 }
  0xa8   :  { %v208_v21 = vpack.c.bf16 %v197_v19, %v197_v19  ;;  %v206_v33 = vpack.c.bf16 %v153_v31, %v153_v31 }
  0xaa   :  { %v214_v24 = vunpack.c.l.b16 %v208_v21 }
  0xad   :  { %v198_v20 = vpop.f32.mrf.mxu1  ;;  %v154_v41 = vpop.f32.mrf.mxu0 }
  0xae   :  { %v199_v22 = vadd.f32 %v399_v18, %v198_v20  ;;  %v155_v43 = vadd.f32 %v400_v26, %v154_v41 }
  0xb0   :  { %v209_v23 = vpack.c.bf16 %v199_v22, %v199_v22  ;;  %v207_v44 = vpack.c.bf16 %v155_v43, %v155_v43 }
  0xb2   :  { %v215_v25 = vunpack.c.l.b16 %v209_v23 }
  0xb4   :  { %v216_v28 = vpack.c.b16 %v215_v25, %v214_v24 }
  0xb5   :  { %v201_v29 = vpop.f32.mrf.mxu1 }
  0xb6   :  { %v221_v30 = vsel %vm133_vm0, %v216_v28, 0  ;;  %v202_v32 = vadd.f32 %v399_v18, %v201_v29 }
  0xb7   :  { %230 = vmatpush.bf16.xpose.msra.mxu2 %v221_v30 }
  0xb8   :  { %v210_v35 = vpack.c.bf16 %v202_v32, %v202_v32 }
  0xba   :  { %v238_v38 = vunpack.c.l.b16 %v210_v35 }
  0xbd   :  { %v203_v34 = vpop.f32.mrf.mxu1 }
  0xbe   :  { %v204_v36 = vadd.f32 %v399_v18, %v203_v34  ;;  %381 = vmatmul.msk.bf16.vlgmr.msra.gmra.mxu2 %vm133_vm0, %v206_v33 }
  0xbf   :  { %311 = vmatpush.bf16.msrb.mxu2 %v299_v5 }
  0xc0   :  { %v211_v37 = vpack.c.bf16 %v204_v36, %v204_v36 }
  0xc2   :  { %v239_v39 = vunpack.c.l.b16 %v211_v37 }
  0xc4   :  { %v240_v40 = vpack.c.b16 %v239_v39, %v238_v38 }
  0xc6   :  { %v245_v42 = vsel %vm133_vm0, %v240_v40, 0 }
  0xc7   :  { %254 = vmatpush.bf16.xpose.msra.mxu3 %v245_v42 }
  0xce   :  { %382 = vmatmul.msk.bf16.vlgmr.msra.gmra.mxu3 %vm133_vm0, %v207_v44 }
  0xcf   :  { %333 = vmatpush.bf16.msrb.mxu3 %v321_v12 }
 0x141   :  { %v232_v45 = vpop.f32.mrf.mxu2 }
 0x142   :  { %v260_v46 = vmul.f32 0.17677669, %v232_v45 }
 0x144   :  { %v263_v47 = vsel %vm262_vm1, %v260_v46, -inf }
 0x145   :  { %264 = vmax.xlane.f32.xlu0 %v263_v47 }
 0x149   :  { %v234_v48 = vpop.f32.mrf.mxu2 }
 0x151   :  { %v256_v49 = vpop.f32.mrf.mxu3 }
 0x152   :  { %v261_v50 = vmul.f32 0.17677669, %v256_v49 }
 0x154   :  { %v266_v51 = vsel %vm262_vm1, %v261_v50, -inf }
 0x155   :  { %267 = vmax.xlane.f32.xlu0 %v266_v51 }
 0x159   :  { %v258_v52 = vpop.f32.mrf.mxu3 }
 0x1b8   :  { %v265_v53 = vpop.xlane.xlu0 %264 }
 0x1b9   :  { %v269_v54 = vsub.f32 %v260_v46, %v265_v53 }
 0x1bb   :  { %v271_v55 = vmul.f32 1.442695, %v269_v54 }
 0x1bd   :  { %401 = vpow2.f32 %v271_v55 }
 0x1c3   :  { %v402_v56 = vpop.eup %401 }
 0x1c4   :  { %v275_v57 = vsel %vm262_vm1, %v402_v56, 0.0 }
 0x1c5   :  { %276 = vadd.xlane.f32.xlu1 %v275_v57 }
 0x1c8   :  { %v268_v58 = vpop.xlane.xlu0 %267 }
 0x1c9   :  { %v270_v59 = vsub.f32 %v261_v50, %v268_v58 }
 0x1cb   :  { %v273_v60 = vmul.f32 1.442695, %v270_v59 }
 0x1cd   :  { %403 = vpow2.f32 %v273_v60 }
 0x1d3   :  { %v404_v61 = vpop.eup %403 }
 0x1d4   :  { %v278_v62 = vsel %vm262_vm1, %v404_v61, 0.0 }
 0x1d5   :  { %279 = vadd.xlane.f32.xlu1 %v278_v62 }
 0x238   :  { %v277_v13 = vpop.xlane.xlu1 %276 }
 0x239   :  { %405 = vrcp.f32 %v277_v13 }
 0x23f   :  { %v406_v14 = vpop.eup %405 }
 0x240   :  { %v283_v15 = vmul.f32 %v406_v14, %v402_v56 }
 0x242   :  { %v293_v16 = vpack.c.bf16 %v283_v15, %v283_v15 }
 0x244   :  { %383 = vmatmul.msk.bf16.vlgmr.msrb.gmra.mxu2 %vm262_vm1, %v293_v16 }
 0x248   :  { %v280_v17 = vpop.xlane.xlu1 %279 }
 0x249   :  { %407 = vrcp.f32 %v280_v17 }
 0x24f   :  { %v408_v18 = vpop.eup %407 }
 0x250   :  { %v284_v19 = vmul.f32 %v408_v18, %v404_v61 }
 0x252   :  { %v294_v20 = vpack.c.bf16 %v284_v19, %v284_v19 }
 0x254   :  { %384 = vmatmul.msk.bf16.vlgmr.msrb.gmra.mxu3 %vm262_vm1, %v294_v20 }
 0x2c7   :  { %v313_v21 = vpop.f32.mrf.mxu2 }
 0x2c8   :  { %339 = vst.msk [vmem:[#allocation11] sm:$0xff] %vm133_vm0, %v313_v21 }
 0x2cf   :  { %v315_v22 = vpop.f32.mrf.mxu2 }
 0x2d7   :  { %v335_v23 = vpop.f32.mrf.mxu3 }
 0x2d8   :  { %340 = vst.msk [vmem:[#allocation11 + $0x8] sm:$0xff] %vm133_vm0, %v335_v23 }
 0x2d9   :  { %353 = dma.vmem_to_hbm [thread:$0]  %s346_s6, 256, %s348_s8, [#allocation4], %s562_s9, %s562_s9, %s563_s10  }
 0x2df   :  { %v337_v24 = vpop.f32.mrf.mxu3 }
 0x2e0   :  { %559 = dma.done.wait [#allocation4], 256  }
 0x2e1   :  { %560 = vsyncadd [#allocation4], 4294967040 }
 0x2e2   :  { %358 = vsyncpa [#allocation3], 1 }
 0x2e3   :  { %359 = vsyncpa [#allocation6], 1 }
 0x2e4   :  { %360 = vsyncpa [#allocation9], 1 }
 0x2e5   :  { %361 = vsyncpa [#allocation4], 1 }

</bundles_post_ra>
